<compile_context>
chip_gen: v5e
topology: v5e:2x2
jax: 0.10.0
libtpu: 0.0.40
codegen_flags: <defaults>
</compile_context>

<pallas_src>
import jax
import jax.numpy as jnp
from jax import lax
from jax.experimental import pallas as pl
from jax.experimental.pallas import tpu as pltpu


def _round128(n):
    return max(128, ((int(n) + 127) // 128) * 128)


def _num_tensorcores_per_chip():
    """Best-effort TensorCores-per-chip detection (v7x has 2; v5e/v6e have 1)."""
    try:
        kind = jax.devices()[0].device_kind.lower()
    except Exception:
        return 1
    return 2 if ("v7" in kind or "7x" in kind) else 1


def _kernel_sigmoid(z):
    """Stable sigmoid for in-kernel use: exp(-|z|) only, single EUP reciprocal."""
    e = jnp.exp(-jnp.abs(z))
    inv = pl.reciprocal(1.0 + e, approx=True)   # EUP slot has slack here
    return jnp.where(z >= 0, inv, e * inv)


def climatenet_kernel(x_ref, w1_ref, b1_ref, w2_ref, b2_ref,
                      w34_ref, b34_ref, out_ref):
    """One batch tile, feature-major: activations are (features, batch_tile)."""
    x = x_ref[...]                                                   # (D_in, bt) bf16

    # fc1 + ReLU : (32, D_in) @ (D_in, bt) -> (32, bt), f32 accumulation on MXU
    h1 = jnp.dot(w1_ref[...], x, preferred_element_type=jnp.float32) + b1_ref[...]
    h1 = jnp.maximum(h1, 0.0).astype(w2_ref.dtype)

    # fc2 + ReLU : (64, 32) @ (32, bt) -> (64, bt)
    h2 = jnp.dot(w2_ref[...], h1, preferred_element_type=jnp.float32) + b2_ref[...]
    h2 = jnp.maximum(h2, 0.0).astype(w34_ref.dtype)

    # fused heads: (2, 64) @ (64, bt) -> (2, bt); row 0 = fc3 (sigmoid), row 1 = fc4
    head = jnp.dot(w34_ref[...], h2, preferred_element_type=jnp.float32) + b34_ref[...]
    is_cls = lax.broadcasted_iota(jnp.int32, head.shape, 0) == 0
    out_ref[...] = jnp.where(is_cls, _kernel_sigmoid(head), head).astype(out_ref.dtype)


def pack_params(p):
    """Torch-style f32 params -> fused, bf16, feature-major kernel params.

    torch Linear stores weight as (out, in), which is exactly the orientation
    the feature-major kernel needs (W @ x^T) -- no transpose required.
    """
    w34 = jnp.concatenate([p["fc3_w"], p["fc4_w"]], axis=0)          # (2, 64)
    b34 = jnp.concatenate([p["fc3_b"], p["fc4_b"]], axis=0)          # (2,)
    return dict(
        w1=p["fc1_w"].astype(jnp.bfloat16),                          # (32, D_in)
        b1=p["fc1_b"].reshape(-1, 1).astype(jnp.float32),            # (32, 1)
        w2=p["fc2_w"].astype(jnp.bfloat16),                          # (64, 32)
        b2=p["fc2_b"].reshape(-1, 1).astype(jnp.float32),            # (64, 1)
        w34=w34.astype(jnp.bfloat16),                                # (2, 64)
        b34=b34.reshape(-1, 1).astype(jnp.float32),                  # (2, 1)
    )


def _pick_batch_tile(B):
    """Largest lane-aligned tile <= 4096, balanced to minimize tail padding,
    and (on v7x) split into a multiple of 2 tiles so both TensorCores get work."""
    B128 = _round128(B)
    n_tiles = pl.cdiv(B128, 4096)                 # minimum tiles at the 4096 cap
    num_tc = _num_tensorcores_per_chip()
    if num_tc > 1 and B128 >= num_tc * 128:
        n_tiles = pl.cdiv(n_tiles, num_tc) * num_tc
    return _round128(pl.cdiv(B128, n_tiles))


def climatenet_forward(x, kparams, *, batch_tile=None, x_is_feature_major=False):
    """Forward pass.

    x: [B, D_in] float (torch layout), or [D_in, B] if x_is_feature_major=True.
       Supplying feature-major bf16 input avoids the wrapper transpose/cast pass
       (which otherwise moves ~3x the kernel's own HBM bytes).
    Returns (x_class [B, 1], x_reg [B, 1]) in float32, matching ClimateNet.forward.
    """
    if x_is_feature_major:
        D_in, B = x.shape
        x_t = x
    else:
        B, D_in = x.shape
        x_t = x.T  # one-time transpose so batch lands on the 128-lane axis

    if x_t.dtype != jnp.bfloat16:
        x_t = x_t.astype(jnp.bfloat16)

    if batch_tile is None:
        batch_tile = _pick_batch_tile(B)          # never 128-by-default
    else:
        batch_tile = _round128(batch_tile)

    # Pad the batch (lane) axis to a tile multiple (sliced off before return).
    B_pad = pl.cdiv(B, batch_tile) * batch_tile
    if B_pad != B:
        x_t = jnp.pad(x_t, ((0, 0), (0, B_pad - B)))

    w1, b1 = kparams["w1"], kparams["b1"]
    w2, b2 = kparams["w2"], kparams["b2"]
    w34, b34 = kparams["w34"], kparams["b34"]

    def full_block(a):
        # Constant-index weight/bias blocks: <10 KB total, VMEM-resident across steps.
        return pl.BlockSpec(a.shape, lambda i: (0,) * a.ndim)

    out = pl.pallas_call(
        climatenet_kernel,
        out_shape=jax.ShapeDtypeStruct((2, B_pad), jnp.float32),
        grid_spec=pltpu.PrefetchScalarGridSpec(
            num_scalar_prefetch=0,
            grid=(B_pad // batch_tile,),
            in_specs=[
                pl.BlockSpec((D_in, batch_tile), lambda i: (0, i)),
                full_block(w1), full_block(b1),
                full_block(w2), full_block(b2),
                full_block(w34), full_block(b34),
            ],
            out_specs=pl.BlockSpec((2, batch_tile), lambda i: (0, i)),
        ),
        compiler_params=pltpu.CompilerParams(
            dimension_semantics=("parallel",)),
    )(x_t, w1, b1, w2, b2, w34, b34)

    # Never expose padded columns to callers.
    x_class = out[0, :B].reshape(B, 1)
    x_reg = out[1, :B].reshape(B, 1)
    return x_class, x_reg


def init_params(key, input_shape):
    """Torch-style synthetic parameters (weight (out,in), bias (out,))."""
    ks = jax.random.split(key, 8)

    def linear(kw, kb, fan_in, fan_out):
        bound = 1.0 / (fan_in ** 0.5)
        w = jax.random.uniform(kw, (fan_out, fan_in), jnp.float32, -bound, bound)
        b = jax.random.uniform(kb, (fan_out,), jnp.float32, -bound, bound)
        return w, b

    w1, b1 = linear(ks[0], ks[1], input_shape, 32)
    w2, b2 = linear(ks[2], ks[3], 32, 64)
    w3, b3 = linear(ks[4], ks[5], 64, 1)
    w4, b4 = linear(ks[6], ks[7], 64, 1)
    return dict(fc1_w=w1, fc1_b=b1, fc2_w=w2, fc2_b=b2,
                fc3_w=w3, fc3_b=b3, fc4_w=w4, fc4_b=b4)


def reference_forward_bf16(x, kp):
    """Pure-JAX reference mirroring the kernel numerics (bf16 in, f32 accum)."""
    f32 = jnp.float32
    xb = x.astype(jnp.bfloat16)
    h1 = jnp.dot(xb, kp["w1"].T, preferred_element_type=f32) + kp["b1"].T
    h1 = jnp.maximum(h1, 0.0).astype(jnp.bfloat16)
    h2 = jnp.dot(h1, kp["w2"].T, preferred_element_type=f32) + kp["b2"].T
    h2 = jnp.maximum(h2, 0.0).astype(jnp.bfloat16)
    head = jnp.dot(h2, kp["w34"].T, preferred_element_type=f32) + kp["b34"].T
    return jax.nn.sigmoid(head[:, 0:1]), head[:, 1:2]


def reference_forward_f32(x, p):
    """Pure-f32 reference matching the torch module forward exactly."""
    h1 = jnp.maximum(x @ p["fc1_w"].T + p["fc1_b"], 0.0)
    h2 = jnp.maximum(h1 @ p["fc2_w"].T + p["fc2_b"], 0.0)
    cls = jax.nn.sigmoid(h2 @ p["fc3_w"].T + p["fc3_b"])
    reg = h2 @ p["fc4_w"].T + p["fc4_b"]
    return cls, reg


if __name__ == "__main__":
    key = jax.random.PRNGKey(0)
    k_x, k_p = jax.random.split(key)

    B, D_in = 512, 16                     # small synthetic batch / feature size
    x = jax.random.normal(k_x, (B, D_in), jnp.float32)   # torch layout, f32
    params = init_params(k_p, D_in)       # torch-style f32 params
    kparams = pack_params(params)         # fused / bf16 / feature-major

    # Optimized path: producer supplies feature-major bf16 input -> the kernel is
    # the only HBM pass over the activations (no wrapper transpose/cast/pad op).
    x_fm = x.T.astype(jnp.bfloat16)                       # (D_in, B)
    cls_out, reg_out = climatenet_forward(x_fm, kparams, x_is_feature_major=True)
    jax.block_until_ready((cls_out, reg_out))
    assert cls_out.shape == (B, 1) and reg_out.shape == (B, 1)

    # Torch-layout path (extra transpose/cast) must match the feature-major path.
    cls2, reg2 = climatenet_forward(x, kparams)
    jax.block_until_ready((cls2, reg2))
    assert jnp.allclose(cls_out, cls2, atol=1e-6, rtol=1e-6)
    assert jnp.allclose(reg_out, reg2, atol=1e-6, rtol=1e-6)

    # Check against a reference with identical bf16/f32 matmul numerics.
    # (cls tolerance loosened to 5e-3 because the kernel uses the EUP approximate
    #  reciprocal in the sigmoid; reg is unaffected and stays at 1e-4.)
    cls_ref, reg_ref = reference_forward_bf16(x, kparams)
    assert jnp.allclose(reg_out, reg_ref, atol=1e-4, rtol=1e-4)
    assert jnp.allclose(cls_out, cls_ref, atol=5e-3, rtol=5e-3)

    # Loose check against the full-f32 torch-semantics reference.
    cls_f32, reg_f32 = reference_forward_f32(x, params)
    assert jnp.allclose(cls_out, cls_f32, atol=5e-2, rtol=5e-2)
    assert jnp.allclose(reg_out, reg_f32, atol=5e-2, rtol=5e-2)

    print("KERNEL_OK")
</pallas_src>

<mosaic_0001>
module attributes {stable_mosaic.version = 11 : i64} {
  func.func @climatenet_kernel(%arg0: i32, %arg1: memref<16x512xbf16, #tpu.memory_space<vmem>>, %arg2: memref<32x16xbf16, #tpu.memory_space<vmem>>, %arg3: memref<32x1xf32, #tpu.memory_space<vmem>>, %arg4: memref<64x32xbf16, #tpu.memory_space<vmem>>, %arg5: memref<64x1xf32, #tpu.memory_space<vmem>>, %arg6: memref<2x64xbf16, #tpu.memory_space<vmem>>, %arg7: memref<2x1xf32, #tpu.memory_space<vmem>>, %arg8: memref<2x512xf32, #tpu.memory_space<vmem>>) attributes {dimension_semantics = [#tpu.dimension_semantics<parallel>], iteration_bounds = array<i64: 1>, scalar_prefetch = 0 : i64, scratch_operands = 0 : i64, tpu.core_type = #tpu.core_type<tc>, window_params = [{transform_indices = @transform_0, window_bounds = array<i64: 16, 512>}, {pipeline_mode = #tpu.pipeline_mode<synchronous>, transform_indices = @transform_1, window_bounds = array<i64: 32, 16>}, {pipeline_mode = #tpu.pipeline_mode<synchronous>, transform_indices = @transform_2, window_bounds = array<i64: 32, 1>}, {pipeline_mode = #tpu.pipeline_mode<synchronous>, transform_indices = @transform_3, window_bounds = array<i64: 64, 32>}, {pipeline_mode = #tpu.pipeline_mode<synchronous>, transform_indices = @transform_4, window_bounds = array<i64: 64, 1>}, {pipeline_mode = #tpu.pipeline_mode<synchronous>, transform_indices = @transform_5, window_bounds = array<i64: 2, 64>}, {pipeline_mode = #tpu.pipeline_mode<synchronous>, transform_indices = @transform_6, window_bounds = array<i64: 2, 1>}, {transform_indices = @transform_7, window_bounds = array<i64: 2, 512>}]} {
    %c0 = arith.constant 0 : index
    %c0_0 = arith.constant 0 : index
    %0 = vector.load %arg1[%c0, %c0_0] : memref<16x512xbf16, #tpu.memory_space<vmem>>, vector<16x512xbf16>
    %c0_1 = arith.constant 0 : index
    %c0_2 = arith.constant 0 : index
    %1 = vector.load %arg2[%c0_1, %c0_2] : memref<32x16xbf16, #tpu.memory_space<vmem>>, vector<32x16xbf16>
    %cst = arith.constant dense<0.000000e+00> : vector<32x512xf32>
    %2 = tpu.matmul %1, %0, %cst {dimension_numbers = #tpu.dot_dimension_numbers<[1], [0], [0], [1], [0, 0, 1, 1], [], []>} : vector<32x16xbf16>, vector<16x512xbf16>, vector<32x512xf32> -> vector<32x512xf32>
    %c0_3 = arith.constant 0 : index
    %c0_4 = arith.constant 0 : index
    %3 = vector.load %arg3[%c0_3, %c0_4] : memref<32x1xf32, #tpu.memory_space<vmem>>, vector<32x1xf32>
    %4 = vector.broadcast %3 : vector<32x1xf32> to vector<32x512xf32>
    %5 = arith.addf %2, %4 : vector<32x512xf32>
    %cst_5 = arith.constant 0.000000e+00 : f32
    %6 = vector.broadcast %cst_5 : f32 to vector<32x512xf32>
    %7 = arith.maximumf %5, %6 : vector<32x512xf32>
    %8 = arith.truncf %7 : vector<32x512xf32> to vector<32x512xbf16>
    %c0_6 = arith.constant 0 : index
    %c0_7 = arith.constant 0 : index
    %9 = vector.load %arg4[%c0_6, %c0_7] : memref<64x32xbf16, #tpu.memory_space<vmem>>, vector<64x32xbf16>
    %cst_8 = arith.constant dense<0.000000e+00> : vector<64x512xf32>
    %10 = tpu.matmul %9, %8, %cst_8 {dimension_numbers = #tpu.dot_dimension_numbers<[1], [0], [0], [1], [0, 0, 1, 1], [], []>} : vector<64x32xbf16>, vector<32x512xbf16>, vector<64x512xf32> -> vector<64x512xf32>
    %c0_9 = arith.constant 0 : index
    %c0_10 = arith.constant 0 : index
    %11 = vector.load %arg5[%c0_9, %c0_10] : memref<64x1xf32, #tpu.memory_space<vmem>>, vector<64x1xf32>
    %12 = vector.broadcast %11 : vector<64x1xf32> to vector<64x512xf32>
    %13 = arith.addf %10, %12 : vector<64x512xf32>
    %cst_11 = arith.constant 0.000000e+00 : f32
    %14 = vector.broadcast %cst_11 : f32 to vector<64x512xf32>
    %15 = arith.maximumf %13, %14 : vector<64x512xf32>
    %16 = arith.truncf %15 : vector<64x512xf32> to vector<64x512xbf16>
    %c0_12 = arith.constant 0 : index
    %c0_13 = arith.constant 0 : index
    %17 = vector.load %arg6[%c0_12, %c0_13] : memref<2x64xbf16, #tpu.memory_space<vmem>>, vector<2x64xbf16>
    %cst_14 = arith.constant dense<0.000000e+00> : vector<2x512xf32>
    %18 = tpu.matmul %17, %16, %cst_14 {dimension_numbers = #tpu.dot_dimension_numbers<[1], [0], [0], [1], [0, 0, 1, 1], [], []>} : vector<2x64xbf16>, vector<64x512xbf16>, vector<2x512xf32> -> vector<2x512xf32>
    %c0_15 = arith.constant 0 : index
    %c0_16 = arith.constant 0 : index
    %19 = vector.load %arg7[%c0_15, %c0_16] : memref<2x1xf32, #tpu.memory_space<vmem>>, vector<2x1xf32>
    %20 = vector.broadcast %19 : vector<2x1xf32> to vector<2x512xf32>
    %21 = arith.addf %18, %20 : vector<2x512xf32>
    %22 = tpu.iota {dimensions = array<i32: 0>} : vector<2x512xi32>
    %c0_i32 = arith.constant 0 : i32
    %23 = vector.broadcast %c0_i32 : i32 to vector<2x512xi32>
    %24 = arith.cmpi eq, %22, %23 : vector<2x512xi32>
    %25 = math.absf %21 : vector<2x512xf32>
    %cst_17 = arith.constant 0.000000e+00 : f32
    %26 = vector.broadcast %cst_17 : f32 to vector<2x512xf32>
    %27 = arith.subf %26, %25 : vector<2x512xf32>
    %28 = math.exp %27 : vector<2x512xf32>
    %cst_18 = arith.constant 1.000000e+00 : f32
    %29 = vector.broadcast %cst_18 : f32 to vector<2x512xf32>
    %30 = arith.addf %29, %28 : vector<2x512xf32>
    %31 = tpu.reciprocal %30 {approx = true} : vector<2x512xf32> -> vector<2x512xf32>
    %cst_19 = arith.constant 0.000000e+00 : f32
    %32 = vector.broadcast %cst_19 : f32 to vector<2x512xf32>
    %33 = arith.cmpf oge, %21, %32 : vector<2x512xf32>
    %34 = arith.mulf %28, %31 : vector<2x512xf32>
    %35 = arith.select %33, %31, %34 : vector<2x512xi1>, vector<2x512xf32>
    %36 = arith.select %24, %35, %21 : vector<2x512xi1>, vector<2x512xf32>
    %c0_20 = arith.constant 0 : index
    %c0_21 = arith.constant 0 : index
    %37 = vector.load %arg8[%c0_20, %c0_21] : memref<2x512xf32, #tpu.memory_space<vmem>>, vector<2x512xf32>
    tpu.vector_store %arg8[%c0_20, %c0_21], %36 {strides = array<i32>} : memref<2x512xf32, #tpu.memory_space<vmem>>, vector<2x512xf32>,
    return
  }
  func.func @transform_0(%arg0: i32) -> (i32, i32) {
    %c0_i32 = arith.constant 0 : i32
    %c0_i32_0 = arith.constant 0 : i32
    return %c0_i32, %arg0 : i32, i32
  }
  func.func @transform_1(%arg0: i32) -> (i32, i32) {
    %c0_i32 = arith.constant 0 : i32
    %c0_i32_0 = arith.constant 0 : i32
    %c0_i32_1 = arith.constant 0 : i32
    return %c0_i32, %c0_i32_0 : i32, i32
  }
  func.func @transform_2(%arg0: i32) -> (i32, i32) {
    %c0_i32 = arith.constant 0 : i32
    %c0_i32_0 = arith.constant 0 : i32
    %c0_i32_1 = arith.constant 0 : i32
    return %c0_i32, %c0_i32_0 : i32, i32
  }
  func.func @transform_3(%arg0: i32) -> (i32, i32) {
    %c0_i32 = arith.constant 0 : i32
    %c0_i32_0 = arith.constant 0 : i32
    %c0_i32_1 = arith.constant 0 : i32
    return %c0_i32, %c0_i32_0 : i32, i32
  }
  func.func @transform_4(%arg0: i32) -> (i32, i32) {
    %c0_i32 = arith.constant 0 : i32
    %c0_i32_0 = arith.constant 0 : i32
    %c0_i32_1 = arith.constant 0 : i32
    return %c0_i32, %c0_i32_0 : i32, i32
  }
  func.func @transform_5(%arg0: i32) -> (i32, i32) {
    %c0_i32 = arith.constant 0 : i32
    %c0_i32_0 = arith.constant 0 : i32
    %c0_i32_1 = arith.constant 0 : i32
    return %c0_i32, %c0_i32_0 : i32, i32
  }
  func.func @transform_6(%arg0: i32) -> (i32, i32) {
    %c0_i32 = arith.constant 0 : i32
    %c0_i32_0 = arith.constant 0 : i32
    %c0_i32_1 = arith.constant 0 : i32
    return %c0_i32, %c0_i32_0 : i32, i32
  }
  func.func @transform_7(%arg0: i32) -> (i32, i32) {
    %c0_i32 = arith.constant 0 : i32
    %c0_i32_0 = arith.constant 0 : i32
    return %c0_i32, %arg0 : i32, i32
  }
}

</mosaic_0001>

<bundles_post_ra>
// kernel: tpu_custom_call.1
= control target key start
LH: loop header
LB: loop body
LE: loop exit
PB: predicated region body
PF: predicated region fallthrough
CT: control target
= control target key end

     0   :  { %v712_v13 = vmov 0   ;;  %vm90_vm0 = vcmask 130048   ;;  %s947_s0 = inlined_call_operand.vmem [shape: bf16[16,512], index: 0, kind: input, shape index: {}]   ;;  %s948_s1 = inlined_call_operand.vmem [shape: bf16[32,16], index: 1, kind: input, shape index: {}]   ;;  %s949_s2 = inlined_call_operand.vmem [shape: f32[32,1], index: 2, kind: input, shape index: {}]   ;;  %s950_s3 = inlined_call_operand.vmem [shape: bf16[64,32], index: 3, kind: input, shape index: {}]   ;;  %s951_s4 = inlined_call_operand.vmem [shape: f32[64,1], index: 4, kind: input, shape index: {}]   ;;  %s952_s5 = inlined_call_operand.vmem [shape: bf16[2,64], index: 5, kind: input, shape index: {}]   ;;  %s953_s6 = inlined_call_operand.vmem [shape: f32[2,1], index: 6, kind: input, shape index: {}]   ;;  %s954_s7 = inlined_call_operand.hbm [shape: f32[2,512], index: 7, kind: output, shape index: {}]  }
   0x1   :  { %v597_v0 = vld [vmem:[%s947_s0] sm:$0xf]  ;;  %v657_v1 = vld [vmem:[%s947_s0 + $0xc] sm:$0xf0]  ;;  %v655_v2 = vld [vmem:[%s947_s0 + $0x4] sm:$0xf]  ;;  %667 = vset.pattern.permute.xlu0 %v712_v13  ;;  %668 = vset.pattern.permute.xlu1 %v712_v13 }
   0x2   :  { %v598_v3 = vor.u32 %v657_v1, %v597_v0  ;;  %v599_v4 = vld [vmem:[%s947_s0 + $0x10] sm:$0xf0]  ;;  %v605_v5 = vld [vmem:[%s947_s0 + $0x8] sm:$0xf]  ;;  %v658_v6 = vld [vmem:[%s947_s0 + $0x14] sm:$0xf0] }
   0x3   :  { %v602_v7 = vor.u32 %v655_v2, %v599_v4  ;;  %v606_v8 = vor.u32 %v658_v6, %v605_v5  ;;  %v656_v9 = vld [vmem:[%s947_s0 + $0xc] sm:$0xf]  ;;  %v607_v10 = vld [vmem:[%s947_s0 + $0x18] sm:$0xf0]  ;;  %v659_v11 = vld [vmem:[%s948_s1] sm:$0xff] }
   0x4   :  { %104 = vmatpush.bf16.msra.mxu0 %v598_v3  ;;  %v610_v12 = vor.u32 %v656_v9, %v607_v10  ;;  %v38_v14 = vld [vmem:[%s949_s2 + $0x10] sm:$0xff]  ;;  %v36_v15 = vld [vmem:[%s949_s2] sm:$0xff] }
   0x5   :  { %123 = vmatpush.bf16.msra.mxu1 %v602_v7  ;;  %142 = vmatpush.bf16.msra.mxu2 %v606_v8 }
   0x6   :  { %161 = vmatpush.bf16.msra.mxu3 %v610_v12  ;;  %52 = vperm.xlu0 %667, %v38_v14  }
   0x7   :  { %611 = vmatmul.msk.bf16.vlgmr.msra.gmra.mxu0 %vm90_vm0, %v659_v11 }
   0x8   :  { %12 = vsyncpa [#allocation3], 0  ;;  %613 = vmatmul.msk.bf16.vlgmr.msra.gmra.mxu1 %vm90_vm0, %v659_v11  ;;  %615 = vmatmul.msk.bf16.vlgmr.msra.gmra.mxu2 %vm90_vm0, %v659_v11  ;;  %v39_v16 = vld [vmem:[%s949_s2 + $0x18] sm:$0xff]  ;;  %v37_v17 = vld [vmem:[%s949_s2 + $0x8] sm:$0xff]  ;;  %vm273_vm1 = vcmask 261120   ;;  %vm457_vm2 = vcmask 523264  }
   0x9   :  { %617 = vmatmul.msk.bf16.vlgmr.msra.gmra.mxu3 %vm90_vm0, %v659_v11  ;;  %42 = vperm.xlu1 %668, %v36_v15   ;;  %v660_v18 = vld [vmem:[%s948_s1 + $0x8] sm:$0xff]  ;;  %v209_v19 = vld [vmem:[%s951_s4 + $0x20] sm:$0xff]  ;;  %v208_v21 = vld [vmem:[%s951_s4 + $0x18] sm:$0xff]  ;;  %vm563_vm8 = vcmask 1041408   ;;  %vm565_vm9 = vcmask 1045508   ;;  %s578_s30 = sshll.u32 %s954_s7, 4  ;;  %s579_s30 = int_to_ptr.hbm [resolvable:$true] %s578_s30 }
   0xa   :  { %669 = vset.pattern.permute.xlu2 %v712_v13  ;;  %v210_v20 = vld [vmem:[%s951_s4 + $0x28] sm:$0xff]  ;;  %v205_v22 = vld [vmem:[%s951_s4] sm:$0xff]  ;;  %v211_v40 = vld [vmem:[%s951_s4 + $0x30] sm:$0xff]  ;;  %vm567_vm10 = vcmask 1043456  }
   0xb   :  { %v451_v23 = vld [vmem:[%s953_s6] sm:$0x3]  ;;  %245 = vperm.xlu2 %669, %v211_v40   ;;  %v212_v62 = vld [vmem:[%s951_s4 + $0x38] sm:$0xff] }
   0xc   :  { %v661_v11 = vld [vmem:[%s950_s3] sm:$0xff] }
   0xe   :  { %57 = vperm.xlu0 %667, %v39_v16  }
  0x11   :  { %47 = vperm.xlu1 %668, %v37_v17  }
  0x13   :  { %250 = vperm.xlu2 %669, %v212_v62  }
  0x16   :  { %235 = vperm.xlu0 %667, %v209_v19  }
  0x17   :  { %612 = vmatmul.msk.bf16.gmra.mxu0 %vm90_vm0, %v660_v18 }
  0x18   :  { %614 = vmatmul.msk.bf16.gmra.mxu1 %vm90_vm0, %v660_v18  ;;  %616 = vmatmul.msk.bf16.gmra.mxu2 %vm90_vm0, %v660_v18 }
  0x19   :  { %618 = vmatmul.msk.bf16.gmra.mxu3 %vm90_vm0, %v660_v18  ;;  %240 = vperm.xlu1 %668, %v210_v20  }
  0x1e   :  { %230 = vperm.xlu0 %667, %v208_v21   ;;  %v207_v21 = vld [vmem:[%s951_s4 + $0x10] sm:$0xff] }
  0x1f   :  { %225 = vperm.xlu2 %669, %v207_v21  }
  0x21   :  { %215 = vperm.xlu1 %668, %v205_v22  }
  0x26   :  { %454 = vperm.xlu0 %667, %v451_v23  }
  0x78   :  { %v53_v30 = vpop.permute.xlu0 %52 }
  0x7b   :  { %v43_v31 = vpop.permute.xlu1 %42 }
  0x80   :  { %v58_v36 = vpop.permute.xlu0 %57 }
  0x83   :  { %v48_v37 = vpop.permute.xlu1 %47 }
  0x84   :  { %v106_v24 = vpop.f32.mrf.mxu0 }
  0x85   :  { %v125_v25 = vpop.f32.mrf.mxu1  ;;  %v107_v46 = vadd.f32 %v106_v24, %v43_v31  ;;  %v206_v24 = vld [vmem:[%s951_s4 + $0x8] sm:$0xff] }
  0x86   :  { %v126_v49 = vadd.f32 %v125_v25, %v43_v31  ;;  %220 = vperm.xlu2 %669, %v206_v24   ;;  %v662_v25 = vld [vmem:[%s950_s3 + $0x8] sm:$0xff] }
  0x87   :  { %v173_v56 = vmax.f32 %v107_v46, 0.0 }
  0x88   :  { %v174_v60 = vmax.f32 %v126_v49, 0.0 }
  0x8b   :  { %v144_v26 = vpop.f32.mrf.mxu2 }
  0x8c   :  { %v163_v27 = vpop.f32.mrf.mxu3  ;;  %v108_v28 = vpop.f32.mrf.mxu0  ;;  %v145_v7 = vadd.f32 %v144_v26, %v43_v31  ;;  %v663_v26 = vld [vmem:[%s950_s3 + $0x10] sm:$0xff] }
  0x8d   :  { %v127_v29 = vpop.f32.mrf.mxu1  ;;  %v109_v47 = vadd.f32 %v108_v28, %v48_v37  ;;  %v164_v12 = vadd.f32 %v163_v27, %v43_v31  ;;  %v664_v27 = vld [vmem:[%s950_s3 + $0x18] sm:$0xff] }
  0x8e   :  { %v128_v50 = vadd.f32 %v127_v29, %v48_v37  ;;  %v175_v19 = vmax.f32 %v145_v7, 0.0 }
  0x8f   :  { %v177_v57 = vmax.f32 %v109_v47, 0.0  ;;  %v176_v20 = vmax.f32 %v164_v12, 0.0 }
  0x90   :  { %v178_v61 = vmax.f32 %v128_v50, 0.0 }
  0x91   :  { %v189_v6 = vpack.c.bf16 %v177_v57, %v173_v56 }
  0x92   :  { %v190_v10 = vpack.c.bf16 %v178_v61, %v174_v60  ;;  %v241_v60 = vpop.permute.xlu1 %240 }
  0x93   :  { %v146_v32 = vpop.f32.mrf.mxu2 }
  0x94   :  { %v165_v33 = vpop.f32.mrf.mxu3  ;;  %v111_v34 = vpop.f32.mrf.mxu0  ;;  %v147_v1 = vadd.f32 %v146_v32, %v48_v37 }
  0x95   :  { %v130_v35 = vpop.f32.mrf.mxu1  ;;  %v112_v38 = vadd.f32 %v111_v34, %v53_v30  ;;  %v166_v4 = vadd.f32 %v165_v33, %v48_v37 }
  0x96   :  { %v131_v41 = vadd.f32 %v130_v35, %v53_v30  ;;  %v179_v15 = vmax.f32 %v147_v1, 0.0 }
  0x97   :  { %v181_v51 = vmax.f32 %v112_v38, 0.0  ;;  %v180_v17 = vmax.f32 %v166_v4, 0.0 }
  0x98   :  { %v182_v53 = vmax.f32 %v131_v41, 0.0  ;;  %v191_v22 = vpack.c.bf16 %v179_v15, %v175_v19 }
  0x99   :  { %v192_v23 = vpack.c.bf16 %v180_v17, %v176_v20 }
  0x9b   :  { %v149_v39 = vpop.f32.mrf.mxu2 }
  0x9c   :  { %v168_v42 = vpop.f32.mrf.mxu3  ;;  %v113_v43 = vpop.f32.mrf.mxu0  ;;  %v150_v58 = vadd.f32 %v149_v39, %v53_v30 }
  0x9d   :  { %v114_v44 = vadd.f32 %v113_v43, %v58_v36  ;;  %v132_v45 = vpop.f32.mrf.mxu1  ;;  %v169_v63 = vadd.f32 %v168_v42, %v53_v30  ;;  %v877_v42 = vpop.permute.xlu2 %245 }
  0x9e   :  { %v133_v48 = vadd.f32 %v132_v45, %v58_v36  ;;  %v183_v8 = vmax.f32 %v150_v58, 0.0 }
  0x9f   :  { %v185_v52 = vmax.f32 %v114_v44, 0.0  ;;  %v184_v13 = vmax.f32 %v169_v63, 0.0 }
  0xa0   :  { %v186_v54 = vmax.f32 %v133_v48, 0.0 }
  0xa1   :  { %v193_v55 = vpack.c.bf16 %v185_v52, %v181_v51 }
  0xa2   :  { %v194_v59 = vpack.c.bf16 %v186_v54, %v182_v53  ;;  %v889_v54 = vpop.permute.xlu0 %235 }
  0xa3   :  { %v151_v0 = vpop.f32.mrf.mxu2  ;;  %292 = vmatpush.bf16.msrb.mxu0 %v193_v55 }
  0xa4   :  { %v152_v2 = vadd.f32 %v151_v0, %v58_v36  ;;  %v170_v3 = vpop.f32.mrf.mxu3  ;;  %321 = vmatpush.bf16.msrb.mxu1 %v194_v59 }
  0xa5   :  { %v171_v5 = vadd.f32 %v170_v3, %v58_v36  ;;  %v883_v49 = vpop.permute.xlu2 %250 }
  0xa6   :  { %v187_v9 = vmax.f32 %v152_v2, 0.0 }
  0xa7   :  { %v188_v14 = vmax.f32 %v171_v5, 0.0  ;;  %293 = vmatpush.bf16.msrb.mxu0 %v189_v6 }
  0xa8   :  { %322 = vmatpush.bf16.msrb.mxu1 %v190_v10  ;;  %v195_v16 = vpack.c.bf16 %v187_v9, %v183_v8 }
  0xa9   :  { %v196_v18 = vpack.c.bf16 %v188_v14, %v184_v13 }
  0xaa   :  { %350 = vmatpush.bf16.msrb.mxu2 %v195_v16  ;;  %635 = vmatmul.msk.bf16.vlgmr.msrb.gmra.mxu0 %vm273_vm1, %v661_v11  ;;  %v231_v7 = vpop.permute.xlu0 %230 }
  0xab   :  { %379 = vmatpush.bf16.msrb.mxu3 %v196_v18  ;;  %639 = vmatmul.msk.bf16.vlgmr.msrb.gmra.mxu1 %vm273_vm1, %v661_v11 }
  0xad   :  { %v891_v55 = vpop.permute.xlu2 %225 }
  0xae   :  { %351 = vmatpush.bf16.msrb.mxu2 %v191_v22 }
  0xaf   :  { %380 = vmatpush.bf16.msrb.mxu3 %v192_v23 }
  0xb1   :  { %643 = vmatmul.msk.bf16.vlgmr.msrb.gmra.mxu2 %vm273_vm1, %v661_v11 }
  0xb2   :  { %647 = vmatmul.msk.bf16.vlgmr.msrb.gmra.mxu3 %vm273_vm1, %v661_v11 }
  0xba   :  { %636 = vmatmul.msk.bf16.gmra.mxu0 %vm273_vm1, %v662_v25 }
  0xbb   :  { %640 = vmatmul.msk.bf16.gmra.mxu1 %vm273_vm1, %v662_v25 }
  0xc1   :  { %644 = vmatmul.msk.bf16.gmra.mxu2 %vm273_vm1, %v662_v25 }
  0xc2   :  { %648 = vmatmul.msk.bf16.gmra.mxu3 %vm273_vm1, %v662_v25 }
  0xca   :  { %637 = vmatmul.msk.bf16.gmra.mxu0 %vm273_vm1, %v663_v26 }
  0xcb   :  { %641 = vmatmul.msk.bf16.gmra.mxu1 %vm273_vm1, %v663_v26 }
  0xd1   :  { %645 = vmatmul.msk.bf16.gmra.mxu2 %vm273_vm1, %v663_v26 }
  0xd2   :  { %649 = vmatmul.msk.bf16.gmra.mxu3 %vm273_vm1, %v663_v26 }
  0xda   :  { %638 = vmatmul.msk.bf16.gmra.mxu0 %vm273_vm1, %v664_v27 }
  0xdb   :  { %642 = vmatmul.msk.bf16.gmra.mxu1 %vm273_vm1, %v664_v27 }
  0xe0   :  { %v900_v15 = vpop.permute.xlu2 %220 }
  0xe1   :  { %646 = vmatmul.msk.bf16.gmra.mxu2 %vm273_vm1, %v664_v27 }
  0xe2   :  { %650 = vmatmul.msk.bf16.gmra.mxu3 %vm273_vm1, %v664_v27  ;;  %v216_v27 = vpop.permute.xlu1 %215 }
 0x127   :  { %v859_v28 = vpop.f32.mrf.mxu0 }
 0x128   :  { %v861_v29 = vpop.f32.mrf.mxu1 }
 0x12f   :  { %v297_v30 = vpop.f32.mrf.mxu0 }
 0x130   :  { %v863_v31 = vpop.f32.mrf.mxu1  ;;  %v298_v23 = vadd.f32 %v297_v30, %v900_v15 }
 0x134   :  { %v865_v32 = vpop.f32.mrf.mxu2 }
 0x135   :  { %v867_v33 = vpop.f32.mrf.mxu3 }
 0x137   :  { %v300_v34 = vpop.f32.mrf.mxu0 }
 0x138   :  { %v329_v35 = vpop.f32.mrf.mxu1  ;;  %v301_v10 = vadd.f32 %v300_v34, %v891_v55  ;;  %v327_v34 = vadd.f32 %v863_v31, %v900_v15 }
 0x139   :  { %v330_v16 = vadd.f32 %v329_v35, %v891_v55 }
 0x13a   :  { %v410_v24 = vmax.f32 %v301_v10, 0.0 }
 0x13c   :  { %v869_v36 = vpop.f32.mrf.mxu2 }
 0x13d   :  { %v871_v37 = vpop.f32.mrf.mxu3 }
 0x13f   :  { %v302_v38 = vpop.f32.mrf.mxu0 }
 0x140   :  { %v331_v39 = vpop.f32.mrf.mxu1  ;;  %v303_v11 = vadd.f32 %v302_v38, %v231_v7  ;;  %v411_v38 = vmax.f32 %v330_v16, 0.0  ;;  %v354_v16 = vadd.f32 %v865_v32, %v216_v27 }
 0x141   :  { %v332_v17 = vadd.f32 %v331_v39, %v231_v7  ;;  %v296_v39 = vadd.f32 %v859_v28, %v216_v27 }
 0x142   :  { %v414_v25 = vmax.f32 %v303_v11, 0.0 }
 0x144   :  { %v873_v40 = vpop.f32.mrf.mxu2  ;;  %v438_v30 = vpack.c.bf16 %v414_v25, %v410_v24 }
 0x145   :  { %v875_v41 = vpop.f32.mrf.mxu3 }
 0x147   :  { %v305_v43 = vpop.f32.mrf.mxu0 }
 0x148   :  { %v334_v44 = vpop.f32.mrf.mxu1  ;;  %v306_v5 = vadd.f32 %v305_v43, %v889_v54  ;;  %v415_v43 = vmax.f32 %v332_v17, 0.0 }
 0x149   :  { %v335_v8 = vadd.f32 %v334_v44, %v889_v54  ;;  %v325_v44 = vadd.f32 %v861_v29, %v216_v27 }
 0x14a   :  { %v418_v21 = vmax.f32 %v306_v5, 0.0 }
 0x14b   :  { %v419_v22 = vmax.f32 %v335_v8, 0.0  ;;  %v403_v29 = vmax.f32 %v325_v44, 0.0 }
 0x14c   :  { %v879_v45 = vpop.f32.mrf.mxu2 }
 0x14d   :  { %v881_v46 = vpop.f32.mrf.mxu3  ;;  %v361_v8 = vadd.f32 %v879_v45, %v231_v7  ;;  %v388_v45 = vadd.f32 %v875_v41, %v891_v55  ;;  %v383_v41 = vadd.f32 %v867_v33, %v216_v27  ;;  %v455_v33 = vpop.permute.xlu0 %454 }
 0x14f   :  { %v307_v47 = vpop.f32.mrf.mxu0 }
 0x150   :  { %v336_v48 = vpop.f32.mrf.mxu1  ;;  %v308_v62 = vadd.f32 %v307_v47, %v241_v60 }
 0x151   :  { %v337_v2 = vadd.f32 %v336_v48, %v241_v60  ;;  %v406_v48 = vmax.f32 %v298_v23, 0.0 }
 0x152   :  { %v422_v12 = vmax.f32 %v308_v62, 0.0 }
 0x153   :  { %v423_v18 = vmax.f32 %v337_v2, 0.0 }
 0x154   :  { %v885_v50 = vpop.f32.mrf.mxu2  ;;  %v442_v26 = vpack.c.bf16 %v422_v12, %v418_v21  ;;  %v404_v21 = vmax.f32 %v354_v16, 0.0 }
 0x155   :  { %v887_v51 = vpop.f32.mrf.mxu3  ;;  %v443_v35 = vpack.c.bf16 %v423_v18, %v419_v22  ;;  %v405_v22 = vmax.f32 %v383_v41, 0.0 }
 0x157   :  { %v310_v52 = vpop.f32.mrf.mxu0 }
 0x158   :  { %v339_v53 = vpop.f32.mrf.mxu1  ;;  %v311_v56 = vadd.f32 %v310_v52, %v877_v42 }
 0x159   :  { %v340_v58 = vadd.f32 %v339_v53, %v877_v42 }
 0x15a   :  { %v426_v63 = vmax.f32 %v311_v56, 0.0  ;;  %v407_v56 = vmax.f32 %v327_v34, 0.0 }
 0x15b   :  { %v427_v3 = vmax.f32 %v340_v58, 0.0  ;;  %v439_v58 = vpack.c.bf16 %v415_v43, %v411_v38 }
 0x15c   :  { %v365_v57 = vpop.f32.mrf.mxu2 }
 0x15d   :  { %v394_v59 = vpop.f32.mrf.mxu3 }
 0x15f   :  { %v312_v61 = vpop.f32.mrf.mxu0 }
 0x160   :  { %v313_v0 = vadd.f32 %v312_v61, %v883_v49  ;;  %v341_v1 = vpop.f32.mrf.mxu1  ;;  %v366_v61 = vadd.f32 %v365_v57, %v241_v60 }
 0x161   :  { %v342_v4 = vadd.f32 %v341_v1, %v883_v49  ;;  %v364_v1 = vadd.f32 %v885_v50, %v889_v54  ;;  %v450_v50 = vld [vmem:[%s952_s5] sm:$0x1]  ;;  %s713_s5 = smov [#allocation2]  }
 0x162   :  { %v430_v6 = vmax.f32 %v313_v0, 0.0  ;;  %v395_v0 = vadd.f32 %v394_v59, %v241_v60  ;;  %v424_v59 = vmax.f32 %v366_v61, 0.0  ;;  %s576_s27 = sshll.u32 %s713_s5, 4  ;;  %s577_s27 = int_to_ptr.vmem [resolvable:$true] %s576_s27 }
 0x163   :  { %v431_v9 = vmax.f32 %v342_v4, 0.0  ;;  %v393_v4 = vadd.f32 %v887_v51, %v889_v54  ;;  %v359_v51 = vadd.f32 %v873_v40, %v891_v55  ;;  %v420_v54 = vmax.f32 %v364_v1, 0.0 }
 0x164   :  { %v446_v13 = vpack.c.bf16 %v430_v6, %v426_v63  ;;  %v368_v14 = vpop.f32.mrf.mxu2  ;;  %v402_v63 = vmax.f32 %v296_v39, 0.0  ;;  %v435_v6 = vpack.c.bf16 %v407_v56, %v403_v29  ;;  %v413_v55 = vmax.f32 %v388_v45, 0.0 }
 0x165   :  { %v447_v19 = vpack.c.bf16 %v431_v9, %v427_v3  ;;  %v397_v20 = vpop.f32.mrf.mxu3  ;;  %v369_v47 = vadd.f32 %v368_v14, %v877_v42  ;;  %v425_v9 = vmax.f32 %v395_v0, 0.0  ;;  %v421_v11 = vmax.f32 %v393_v4, 0.0 }
 0x166   :  { %465 = vmatpush.bf16.msra.mxu0 %v446_v13  ;;  %v398_v52 = vadd.f32 %v397_v20, %v877_v42  ;;  %v434_v42 = vpack.c.bf16 %v406_v48, %v402_v63  ;;  %v444_v12 = vpack.c.bf16 %v424_v59, %v420_v54  ;;  %v385_v13 = vadd.f32 %v871_v37, %v900_v15 }
 0x167   :  { %478 = vmatpush.bf16.msra.mxu1 %v447_v19  ;;  %v428_v2 = vmax.f32 %v369_v47, 0.0  ;;  %v445_v40 = vpack.c.bf16 %v425_v9, %v421_v11  ;;  %v412_v17 = vmax.f32 %v359_v51, 0.0 }
 0x168   :  { %v429_v57 = vmax.f32 %v398_v52, 0.0  ;;  %v409_v19 = vmax.f32 %v385_v13, 0.0 }
 0x16a   :  { %466 = vmatpush.bf16.msra.mxu0 %v442_v26 }
 0x16b   :  { %479 = vmatpush.bf16.msra.mxu1 %v443_v35 }
 0x16c   :  { %v370_v53 = vpop.f32.mrf.mxu2 }
 0x16d   :  { %v371_v31 = vadd.f32 %v370_v53, %v883_v49  ;;  %v399_v62 = vpop.f32.mrf.mxu3 }
 0x16e   :  { %v400_v28 = vadd.f32 %v399_v62, %v883_v49  ;;  %467 = vmatpush.bf16.msra.mxu0 %v438_v30  ;;  %v390_v49 = vadd.f32 %v881_v46, %v231_v7  ;;  %v356_v46 = vadd.f32 %v869_v36, %v900_v15  ;;  %v416_v7 = vmax.f32 %v361_v8, 0.0 }
 0x16f   :  { %v432_v3 = vmax.f32 %v371_v31, 0.0  ;;  %480 = vmatpush.bf16.msra.mxu1 %v439_v58  ;;  %v437_v15 = vpack.c.bf16 %v409_v19, %v405_v22 }
 0x170   :  { %v433_v5 = vmax.f32 %v400_v28, 0.0  ;;  %v417_v14 = vmax.f32 %v390_v49, 0.0  ;;  %v408_v36 = vmax.f32 %v356_v46, 0.0  ;;  %v440_v18 = vpack.c.bf16 %v416_v7, %v412_v17 }
 0x171   :  { %v448_v60 = vpack.c.bf16 %v432_v3, %v428_v2 }
 0x172   :  { %v449_v10 = vpack.c.bf16 %v433_v5, %v429_v57  ;;  %468 = vmatpush.bf16.msra.mxu0 %v434_v42  ;;  %v441_v20 = vpack.c.bf16 %v417_v14, %v413_v55  ;;  %v436_v37 = vpack.c.bf16 %v408_v36, %v404_v21  ;;  %v513_v42 = vlaneseq }
 0x173   :  { %481 = vmatpush.bf16.msra.mxu1 %v435_v6  ;;  %491 = vmatpush.bf16.msra.mxu2 %v448_v60 }
 0x174   :  { %504 = vmatpush.bf16.msra.mxu3 %v449_v10  ;;  %v514_v8 = vshrl.u32 %v513_v42, 7 }
 0x175   :  { %651 = vmatmul.msk.bf16.vlgmr.msra.gmra.mxu0 %vm457_vm2, %v450_v50 }
 0x176   :  { %652 = vmatmul.msk.bf16.vlgmr.msra.gmra.mxu1 %vm457_vm2, %v450_v50  ;;  %vm515_vm4 = vcmp.eq.s32.totalorder %v514_v8, 0 }
 0x177   :  { %492 = vmatpush.bf16.msra.mxu2 %v444_v12 }
 0x178   :  { %505 = vmatpush.bf16.msra.mxu3 %v445_v40 }
 0x17b   :  { %493 = vmatpush.bf16.msra.mxu2 %v440_v18 }
 0x17c   :  { %506 = vmatpush.bf16.msra.mxu3 %v441_v20 }
 0x17f   :  { %494 = vmatpush.bf16.msra.mxu2 %v436_v37 }
 0x180   :  { %507 = vmatpush.bf16.msra.mxu3 %v437_v15 }
 0x182   :  { %653 = vmatmul.msk.bf16.vlgmr.msra.gmra.mxu2 %vm457_vm2, %v450_v50 }
 0x183   :  { %654 = vmatmul.msk.bf16.vlgmr.msra.gmra.mxu3 %vm457_vm2, %v450_v50 }
 0x1f2   :  { %v470_v32 = vpop.f32.mrf.mxu0 }
 0x1f3   :  { %v483_v23 = vpop.f32.mrf.mxu1  ;;  %v935_v26 = vadd.f32 %v470_v32, %v455_v33 }
 0x1f4   :  { %v484_v24 = vadd.f32 %v483_v23, %v455_v33 }
 0x1f5   :  { %v516_v38 = vand.u32 2147483647, %v935_v26  ;;  %vm540_vm6 = vcmp.ge.f32.partialorder %v935_v26, 0.0 }
 0x1f6   :  { %v517_v25 = vand.u32 2147483647, %v484_v24  ;;  %vm541_vm3 = vcmp.ge.f32.partialorder %v484_v24, 0.0 }
 0x1f7   :  { %v520_v39 = vsub.f32 0.0, %v516_v38 }
 0x1f8   :  { %v521_v27 = vsub.f32 0.0, %v517_v25 }
 0x1f9   :  { %v524_v44 = vmul.f32 1.442695, %v520_v39 }
 0x1fa   :  { %v472_v34 = vpop.f32.mrf.mxu0  ;;  %v526_v35 = vmul.f32 1.442695, %v521_v27 }
 0x1fb   :  { %v485_v43 = vpop.f32.mrf.mxu1 }
 0x1fc   :  { %670 = vpow2.f32 %v526_v35 }
 0x1fd   :  { %672 = vpow2.f32 %v524_v44 }
 0x202   :  { %v671_v48 = vpop.eup %670 }
 0x203   :  { %v533_v58 = vadd.f32 1.0, %v671_v48  ;;  %v673_v0 = vpop.eup %672 }
 0x204   :  { %v532_v2 = vadd.f32 1.0, %v673_v0 }
 0x205   :  { %v496_v47 = vpop.f32.mrf.mxu2  ;;  %674 = vrcp.f32 %v533_v58 }
 0x206   :  { %v497_v30 = vadd.f32 %v496_v47, %v455_v33  ;;  %v509_v52 = vpop.f32.mrf.mxu3 }
 0x207   :  { %v510_v53 = vadd.f32 %v509_v52, %v455_v33 }
 0x208   :  { %v518_v56 = vand.u32 2147483647, %v497_v30  ;;  %vm542_vm5 = vcmp.ge.f32.partialorder %v497_v30, 0.0 }
 0x209   :  { %v519_v61 = vand.u32 2147483647, %v510_v53  ;;  %vm543_vm7 = vcmp.ge.f32.partialorder %v510_v53, 0.0 }
 0x20a   :  { %v522_v31 = vsub.f32 0.0, %v518_v56 }
 0x20b   :  { %v523_v62 = vsub.f32 0.0, %v519_v61  ;;  %v675_v3 = vpop.eup %674 }
 0x20c   :  { %v528_v63 = vmul.f32 1.442695, %v522_v31  ;;  %v545_v59 = vmul.f32 %v675_v3, %v671_v48 }
 0x20d   :  { %v530_v28 = vmul.f32 1.442695, %v523_v62  ;;  %v498_v29 = vpop.f32.mrf.mxu2 }
 0x20e   :  { %676 = vpow2.f32 %v528_v63  ;;  %v511_v1 = vpop.f32.mrf.mxu3  ;;  %v549_v49 = vsel %vm541_vm3, %v675_v3, %v545_v59 }
 0x20f   :  { %678 = vpow2.f32 %v530_v28  ;;  %v553_v51 = vsel %vm515_vm4, %v549_v49, %v484_v24 }
 0x210   :  { %680 = vrcp.f32 %v532_v2  ;;  %v560_v7 = vrot.slane %v553_v51, 6 }
 0x214   :  { %v677_v4 = vpop.eup %676 }
 0x215   :  { %v679_v57 = vpop.eup %678  ;;  %v534_v5 = vadd.f32 1.0, %v677_v4 }
 0x216   :  { %v535_v6 = vadd.f32 1.0, %v679_v57  ;;  %v681_v60 = vpop.eup %680 }
 0x217   :  { %682 = vrcp.f32 %v534_v5  ;;  %v544_v10 = vmul.f32 %v681_v60, %v673_v0 }
 0x218   :  { %684 = vrcp.f32 %v535_v6 }
 0x219   :  { %v548_v46 = vsel %vm540_vm6, %v681_v60, %v544_v10 }
 0x21a   :  { %v552_v17 = vsel %vm515_vm4, %v548_v46, %v935_v26 }
 0x21b   :  { %v564_v41 = vsel %vm563_vm8, %v552_v17, %v560_v7 }
 0x21d   :  { %v683_v9 = vpop.eup %682 }
 0x21e   :  { %v685_v50 = vpop.eup %684  ;;  %v546_v54 = vmul.f32 %v683_v9, %v677_v4 }
 0x21f   :  { %v547_v45 = vmul.f32 %v685_v50, %v679_v57 }
 0x220   :  { %v550_v11 = vsel %vm542_vm5, %v683_v9, %v546_v54 }
 0x221   :  { %v554_v12 = vsel %vm515_vm4, %v550_v11, %v497_v30  ;;  %v551_v13 = vsel %vm543_vm7, %v685_v50, %v547_v45 }
 0x222   :  { %v561_v14 = vrot.slane %v554_v12, 4  ;;  %v555_v40 = vsel %vm515_vm4, %v551_v13, %v510_v53 }
 0x223   :  { %v562_v16 = vrot.slane %v555_v40, 2 }
 0x225   :  { %v566_v55 = vsel %vm565_vm9, %v561_v14, %v562_v16 }
 0x226   :  { %v568_v36 = vsel %vm567_vm10, %v564_v41, %v566_v55 }
 0x227   :  { %570 = vst [vmem:[#allocation2] sm:$0xff] %v568_v36 }
 0x228   :  { %581 = dma.vmem_to_hbm [thread:$0]  %s577_s27, 128, %s579_s30, [#allocation3]  }
 0x229   :  { %710 = dma.done.wait [#allocation3], 128  }
 0x22a   :  { %711 = vsyncadd [#allocation3], 4294967168 }
 0x22b   :  { %586 = vsyncpa [#allocation3], 1 }

</bundles_post_ra>
